<compile_context>
chip_gen: v5e
topology: v5e:2x2
jax: 0.10.0
libtpu: 0.0.40
codegen_flags: <defaults>
</compile_context>

<pallas_src>
import math
from functools import partial

import numpy as np
import jax
import jax.numpy as jnp
from jax.experimental import pallas as pl
from jax.experimental.pallas import tpu as pltpu


_CPARAMS = pltpu.CompilerParams(
    dimension_semantics=("parallel",),
    vmem_limit_bytes=32 * 1024 * 1024,
)
_DFF_CHUNK = 512   # FFN hidden-dim chunk (bounds the live (Bb*L, chunk) intermediate)


# ----------------------------------------------------------------------------
# Helpers
# ----------------------------------------------------------------------------
def _pick_batch_block(B, L, D, HE, Dff, Fp, dff_chunk, target=8,
                      budget_bytes=12 * 1024 * 1024):
    """Largest divisor of B (<= target) whose per-step working set fits the budget,
    preferring choices that keep >=2 grid steps (v7x has 2 TensorCores)."""
    dffc = min(Dff, dff_chunk)
    # rough per-batch-element f32 activation bytes in the fused layer/head kernels,
    # x2 for BlockSpec double buffering
    per_b = 2 * 4 * L * (HE + 5 * D + dffc + 6 * Fp)
    divs = [d for d in range(1, min(B, target) + 1)
            if B % d == 0 and d * per_b <= budget_bytes]
    if not divs:
        return 1
    multi = [d for d in divs if B // d >= 2]
    return max(multi) if multi else max(divs)


# ----------------------------------------------------------------------------
# Pallas kernels
# ----------------------------------------------------------------------------
def _embed_q_kernel(xp_ref, w3_ref, pe_ref, wq_ref, bq_ref, enc_ref, q_ref):
    # circular Conv1d(k=3, bias=False) built from 3 static slices of the padded
    # input + fixed positional encoding; fused with layer-0 Q projection.
    Bb, Lp2, C = xp_ref.shape
    L = Lp2 - 2
    D = pe_ref.shape[1]
    acc = jnp.zeros((Bb * L, D), jnp.float32)
    for k in range(3):
        xk = xp_ref[:, k:k + L, :].reshape(Bb * L, C)        # bf16 slice of padded input
        acc = acc + jnp.dot(xk, w3_ref[k], preferred_element_type=jnp.float32)
    enc = acc.reshape(Bb, L, D) + pe_ref[...]                # (L,D) broadcasts over Bb
    enc_ref[...] = enc
    q = jnp.dot(enc.reshape(Bb * L, D).astype(jnp.bfloat16), wq_ref[...],
                preferred_element_type=jnp.float32) + bq_ref[...]
    q_ref[...] = q.reshape(Bb, L, D)


def embed_q(xp_bf, tok_w3_bf, pe, wq_bf, bq, Bb):
    B, Lp2, C = xp_bf.shape
    L = Lp2 - 2
    D = pe.shape[1]
    nblk = B // Bb
    spec_act = pl.BlockSpec((Bb, L, D), lambda i: (i, 0, 0))
    return pl.pallas_call(
        _embed_q_kernel,
        out_shape=(jax.ShapeDtypeStruct((B, L, D), jnp.float32),
                   jax.ShapeDtypeStruct((B, L, D), jnp.float32)),
        grid=(nblk,),
        in_specs=[
            pl.BlockSpec((Bb, Lp2, C), lambda i: (i, 0, 0)),
            pl.BlockSpec((3, C, D), lambda i: (0, 0, 0)),
            pl.BlockSpec((L, D), lambda i: (0, 0)),
            pl.BlockSpec((D, D), lambda i: (0, 0)),
            pl.BlockSpec((1, D), lambda i: (0, 0)),
        ],
        out_specs=(spec_act, spec_act),
        compiler_params=_CPARAMS,
    )(xp_bf, tok_w3_bf, pe.astype(jnp.float32), wq_bf,
      bq.reshape(1, D).astype(jnp.float32))


def _layer_kernel(attn_ref, wo_ref, bo_ref, enc_ref, dm_ref, w1_ref, w2_ref, *rest,
                  activation, emit_q, dff_chunk):
    # Fused FEDformer encoder layer tail:
    #   out-proj + residual + decomp1 + FFN(conv1->act->conv2) + residual + decomp2
    #   [+ next layer's Q projection while enc_new is still in VMEM]
    if emit_q:
        wq_ref, bq_ref, enc_out_ref, q_out_ref = rest
    else:
        (enc_out_ref,) = rest
    Bb, L, D = enc_ref.shape
    HE = attn_ref.shape[2]
    Dff = w1_ref.shape[1]
    dm = dm_ref[...]                                        # (L,L) bf16

    def decomp(t3):                                         # residual of moving-avg: (I-A) @ t
        outs = []
        for bi in range(Bb):
            outs.append(jnp.dot(dm, t3[bi].astype(jnp.bfloat16),
                                preferred_element_type=jnp.float32))
        return jnp.stack(outs, axis=0)

    proj = jnp.dot(attn_ref[...].reshape(Bb * L, HE), wo_ref[...],
                   preferred_element_type=jnp.float32) + bo_ref[...]
    t = enc_ref[...] + proj.reshape(Bb, L, D)
    x = decomp(t)                                           # series_decomp #1
    x2 = x.reshape(Bb * L, D)
    xb = x2.astype(jnp.bfloat16)

    acc = jnp.zeros((Bb * L, D), jnp.float32)
    for c0 in range(0, Dff, dff_chunk):                     # FFN, chunked over Dff
        c1 = min(c0 + dff_chunk, Dff)
        h = jnp.dot(xb, w1_ref[:, c0:c1], preferred_element_type=jnp.float32)
        if activation == "relu":
            h = jnp.maximum(h, 0.0)
        else:
            h = jax.nn.gelu(h)
        acc = acc + jnp.dot(h.astype(jnp.bfloat16), w2_ref[c0:c1, :],
                            preferred_element_type=jnp.float32)

    s = (x2 + acc).reshape(Bb, L, D)
    enc_new = decomp(s)                                     # series_decomp #2
    enc_out_ref[...] = enc_new
    if emit_q:
        q = jnp.dot(enc_new.reshape(Bb * L, D).astype(jnp.bfloat16), wq_ref[...],
                    preferred_element_type=jnp.float32) + bq_ref[...]
        q_out_ref[...] = q.reshape(Bb, L, D)


def layer_step(attn_bf, lyr, enc, dm_bf, activation, Bb, wq_next=None, bq_next=None):
    B, L, HE = attn_bf.shape
    D = enc.shape[2]
    Dff = lyr["w_ffn1"].shape[1]
    nblk = B // Bb
    emit_q = wq_next is not None
    dffc = min(Dff, _DFF_CHUNK)
    spec_act = pl.BlockSpec((Bb, L, D), lambda i: (i, 0, 0))

    in_specs = [
        pl.BlockSpec((Bb, L, HE), lambda i: (i, 0, 0)),
        pl.BlockSpec((HE, D), lambda i: (0, 0)),
        pl.BlockSpec((1, D), lambda i: (0, 0)),
        spec_act,
        pl.BlockSpec((L, L), lambda i: (0, 0)),
        pl.BlockSpec((D, Dff), lambda i: (0, 0)),
        pl.BlockSpec((Dff, D), lambda i: (0, 0)),
    ]
    args = [attn_bf, lyr["wo"].astype(jnp.bfloat16),
            lyr["bo"].reshape(1, D).astype(jnp.float32), enc, dm_bf,
            lyr["w_ffn1"].astype(jnp.bfloat16), lyr["w_ffn2"].astype(jnp.bfloat16)]

    if emit_q:
        in_specs += [pl.BlockSpec((D, D), lambda i: (0, 0)),
                     pl.BlockSpec((1, D), lambda i: (0, 0))]
        args += [wq_next.astype(jnp.bfloat16), bq_next.reshape(1, D).astype(jnp.float32)]
        out_shape = (jax.ShapeDtypeStruct((B, L, D), jnp.float32),
                     jax.ShapeDtypeStruct((B, L, D), jnp.float32))
        out_specs = (spec_act, spec_act)
    else:
        out_shape = jax.ShapeDtypeStruct((B, L, D), jnp.float32)
        out_specs = spec_act

    return pl.pallas_call(
        partial(_layer_kernel, activation=activation, emit_q=emit_q, dff_chunk=dffc),
        out_shape=out_shape, grid=(nblk,),
        in_specs=in_specs, out_specs=out_specs,
        compiler_params=_CPARAMS,
    )(*args)


def _head_kernel(enc_ref, g_ref, bt_ref, w_ref, b_ref, X_ref, m_ref, xo_ref, im_ref,
                 imp_ref, sums_ref):
    # SeasonalLayerNorm + output projection (F padded to 128 lanes) + imputation
    # + SAITS masked-MAE partial sums.
    Bb, L, D = enc_ref.shape
    Fp = w_ref.shape[1]
    x = enc_ref[...]
    mu = jnp.mean(x, axis=-1, keepdims=True)
    var = jnp.mean(jnp.square(x - mu), axis=-1, keepdims=True)
    xh = (x - mu) * jax.lax.rsqrt(var + 1e-5) * g_ref[...] + bt_ref[...]
    xh = xh - jnp.mean(xh, axis=1, keepdims=True)            # subtract per-batch temporal mean
    recon = jnp.dot(xh.reshape(Bb * L, D).astype(jnp.bfloat16), w_ref[...],
                    preferred_element_type=jnp.float32) + b_ref[...]
    recon = recon.reshape(Bb, L, Fp)
    X = X_ref[...]
    m = m_ref[...]
    im = im_ref[...]
    imp_ref[...] = m * X + (1.0 - m) * recon
    err = jnp.abs(recon - xo_ref[...])
    s0 = jnp.sum(err * m)
    s1 = jnp.sum(m)
    s2 = jnp.sum(err * im)
    s3 = jnp.sum(im)
    lane = jax.lax.broadcasted_iota(jnp.int32, (1, 1, 128), 2)
    sums_ref[...] = (jnp.where(lane == 0, s0, 0.0) + jnp.where(lane == 1, s1, 0.0)
                     + jnp.where(lane == 2, s2, 0.0) + jnp.where(lane == 3, s3, 0.0))


def head(enc, gamma, beta, out_w_p_bf, out_b_p, Xp, mp, xop, imp_mask_p, Bb):
    B, L, D = enc.shape
    Fp = out_w_p_bf.shape[1]
    nblk = B // Bb
    spec_f = pl.BlockSpec((Bb, L, Fp), lambda i: (i, 0, 0))
    return pl.pallas_call(
        _head_kernel,
        out_shape=(jax.ShapeDtypeStruct((B, L, Fp), jnp.float32),
                   jax.ShapeDtypeStruct((nblk, 1, 128), jnp.float32)),
        grid=(nblk,),
        in_specs=[
            pl.BlockSpec((Bb, L, D), lambda i: (i, 0, 0)),
            pl.BlockSpec((1, D), lambda i: (0, 0)),
            pl.BlockSpec((1, D), lambda i: (0, 0)),
            pl.BlockSpec((D, Fp), lambda i: (0, 0)),
            pl.BlockSpec((1, Fp), lambda i: (0, 0)),
            spec_f, spec_f, spec_f, spec_f,
        ],
        out_specs=(spec_f, pl.BlockSpec((1, 1, 128), lambda i: (i, 0, 0))),
        compiler_params=_CPARAMS,
    )(enc, gamma.reshape(1, D).astype(jnp.float32),
      beta.reshape(1, D).astype(jnp.float32),
      out_w_p_bf, out_b_p.reshape(1, Fp).astype(jnp.float32),
      Xp, mp, xop, imp_mask_p)


# ----------------------------------------------------------------------------
# Model glue (parameter setup, FFT, reshapes)
# ----------------------------------------------------------------------------
def get_frequency_modes(seq_len, modes, mode_select_method="random", seed=0):
    modes = min(modes, seq_len // 2)
    if mode_select_method == "random":
        rng = np.random.RandomState(seed)   # deterministic stand-in for np.random.shuffle
        index = list(range(seq_len // 2))
        rng.shuffle(index)
        index = index[:modes]
    else:
        index = list(range(modes))
    index.sort()
    return index


def build_decomp_residual_matrix(L, window):
    """(I - A) where A is the replicate-padded moving-average operator over time."""
    p = (window - 1) // 2
    A = np.zeros((L, L), np.float32)
    for t in range(L):
        for j in range(-p, p + 1):
            s = min(max(t + j, 0), L - 1)
            A[t, s] += 1.0 / window
    return jnp.asarray(np.eye(L, dtype=np.float32) - A)


def init_params(key, cfg):
    L, F = cfg["n_steps"], cfg["n_features"]
    D, H, Dff, nL = cfg["d_model"], cfg["n_heads"], cfg["d_ffn"], cfg["n_layers"]
    E = D // H
    C = 2 * F
    freq_index = get_frequency_modes(L, cfg["modes"], cfg["mode_select"])
    n_modes = len(freq_index)

    keys = jax.random.split(key, 8 + nL * 16)
    kit = iter(keys)

    def nrm(shape, scale=0.05):
        return scale * jax.random.normal(next(kit), shape, dtype=jnp.float32)

    def uni(shape, scale=1.0):
        return scale * jax.random.uniform(next(kit), shape, dtype=jnp.float32)

    # fixed sinusoidal positional encoding table
    pos = np.arange(L, dtype=np.float32)[:, None]
    div = np.exp(np.arange(0, D, 2, dtype=np.float32) * -(math.log(10000.0) / D))
    pe = np.zeros((L, D), dtype=np.float32)
    pe[:, 0::2] = np.sin(pos * div)
    pe[:, 1::2] = np.cos(pos * div)

    params = {
        # circular Conv1d(k=3, bias=False): tap-k weight is (C_in, d_model) = conv_w[:,:,k].T
        "tok_w": nrm((3, C, D)),
        "pos_enc": jnp.asarray(pe),
        "out_w": nrm((D, F)),
        "out_b": nrm((F,)),
        "ln_gamma": jnp.ones((D,), jnp.float32),
        "ln_beta": jnp.zeros((D,), jnp.float32),
        "decomp_mat": build_decomp_residual_matrix(L, cfg["moving_avg_window_size"]),
        "layers": [],
    }
    fscale = 1.0 / (D * D)
    for _ in range(nL):
        params["layers"].append({
            "wq": nrm((D, D)), "bq": nrm((D,)),
            # wk/bk/wv/bv exist in the PyTorch module but are dead in the
            # FourierBlock forward; kept for structural parity, never computed.
            "wk": nrm((D, D)), "bk": nrm((D,)),
            "wv": nrm((D, D)), "bv": nrm((D,)),
            "wo": nrm((D, D)), "bo": nrm((D,)),
            "fourier_w_re": uni((H, E, E, n_modes), fscale),
            "fourier_w_im": uni((H, E, E, n_modes), fscale),
            "w_ffn1": nrm((D, Dff)),   # Conv1d k=1, bias=False
            "w_ffn2": nrm((Dff, D)),   # Conv1d k=1, bias=False
        })
    return params, freq_index


def fedformer_forward(params, freq_index, inputs, cfg, training=True):
    X = inputs["X"].astype(jnp.float32)
    mask = inputs["missing_mask"].astype(jnp.float32)
    B, L, F = X.shape
    D, H, Dff = cfg["d_model"], cfg["n_heads"], cfg["d_ffn"]
    E = D // H
    HE = H * E
    nbins = L // 2 + 1
    n_modes = len(freq_index)
    idx = jnp.asarray(freq_index, dtype=jnp.int32)
    dm_bf = params["decomp_mat"].astype(jnp.bfloat16)
    Fp = ((F + 127) // 128) * 128
    Bb = _pick_batch_block(B, L, D, HE, Dff, Fp, _DFF_CHUNK)

    # ---- DataEmbedding: circular pad once (B,L+2,2F) bf16; unfold happens in-kernel
    x_in = jnp.concatenate([X, mask], axis=2)                              # (B,L,2F)
    xp = jnp.concatenate([x_in[:, -1:], x_in, x_in[:, :1]], axis=1)        # circular pad 1
    xp = xp.astype(jnp.bfloat16)
    layers = params["layers"]
    enc, q = embed_q(xp, params["tok_w"].astype(jnp.bfloat16), params["pos_enc"][:L],
                     layers[0]["wq"].astype(jnp.bfloat16), layers[0]["bq"], Bb)
    # nn.Dropout -> identity (deterministic forward)

    for li, lyr in enumerate(layers):
        # ---- FourierBlock: rfft/irfft + one real (complex-as-real) mode-mix.
        # TODO(synk): FFT has no Pallas op on TPU; rfft/irfft stay as XLA glue.
        q4 = q.reshape(B, L, H, E)
        x_ft = jnp.fft.rfft(q4, axis=1)                        # (B, nbins, H, E) complex64
        x_sel = jnp.take(x_ft, idx, axis=1)                    # (B, m, H, E)
        xs = jnp.concatenate([x_sel.real, x_sel.imag], axis=-1).astype(jnp.bfloat16)
        wr, wi = lyr["fourier_w_re"], lyr["fourier_w_im"]      # (H, E, E, m)
        w2 = jnp.concatenate(
            [jnp.concatenate([wr, wi], axis=2),
             jnp.concatenate([-wi, wr], axis=2)], axis=1).astype(jnp.bfloat16)  # (H,2E,2E,m)
        out2 = jnp.einsum("bmhi,hiom->bhom", xs, w2,
                          preferred_element_type=jnp.float32)  # (B, H, 2E, m) f32
        out_sel = jax.lax.complex(out2[:, :, :E, :], out2[:, :, E:, :])          # (B,H,E,m)
        out_ft = jnp.pad(out_sel, ((0, 0), (0, 0), (0, 0), (0, nbins - n_modes)))
        attn = jnp.fft.irfft(out_ft, n=L, axis=-1)             # (B,H,E,L) real
        # matches torch `.view(B, L, -1)` applied to the contiguous (B,H,E,L) tensor
        # (PyPOTS FourierBlock does NOT permute back before the view)
        attn = attn.reshape(B, L, HE).astype(jnp.bfloat16)

        # ---- fused layer tail (out-proj + decomp1 + FFN + decomp2 [+ next Wq])
        nxt = layers[li + 1] if li + 1 < len(layers) else None
        if nxt is not None:
            enc, q = layer_step(attn, lyr, enc, dm_bf, cfg["activation"], Bb,
                                wq_next=nxt["wq"], bq_next=nxt["bq"])
        else:
            enc = layer_step(attn, lyr, enc, dm_bf, cfg["activation"], Bb)

    # ---- Seasonal LayerNorm + output projection + imputation + loss partial sums
    pad = Fp - F
    padf = lambda a: jnp.pad(a, ((0, 0), (0, 0), (0, pad)))
    out_w_p = jnp.pad(params["out_w"], ((0, 0), (0, pad))).astype(jnp.bfloat16)
    out_b_p = jnp.pad(params["out_b"], (0, pad))
    imputed_p, sums = head(enc, params["ln_gamma"], params["ln_beta"], out_w_p, out_b_p,
                           padf(X), padf(mask),
                           padf(inputs["X_ori"].astype(jnp.float32)),
                           padf(inputs["indicating_mask"].astype(jnp.float32)), Bb)
    imputed = imputed_p[..., :F]

    tot = jnp.sum(sums, axis=(0, 1))                          # (128,); lanes 0..3 meaningful
    ort = cfg["ORT_weight"] * tot[0] / (tot[1] + 1e-12)
    mit = cfg["MIT_weight"] * tot[2] / (tot[3] + 1e-12)

    results = {"imputed_data": imputed}
    if training:
        # TODO(synk): the fork's SaitsLoss also receives `norm_val`; its exact use is
        # not in the provided source — standard PyPOTS masked-MAE SAITS loss used here.
        results["ORT_loss"] = ort
        results["MIT_loss"] = mit
        results["loss"] = ort + mit
    return results


# ----------------------------------------------------------------------------
if __name__ == "__main__":
    cfg = dict(
        n_steps=8, n_features=4, n_layers=2, n_heads=4, d_model=32, d_ffn=64,
        moving_avg_window_size=5, modes=32, mode_select="random",
        activation="relu", ORT_weight=1.0, MIT_weight=1.0,
    )
    B, L, F = 2, cfg["n_steps"], cfg["n_features"]

    key = jax.random.PRNGKey(0)
    kp, kx, km, ki = jax.random.split(key, 4)
    X_full = jax.random.normal(kx, (B, L, F), jnp.float32)
    missing_mask = (jax.random.uniform(km, (B, L, F)) > 0.3).astype(jnp.float32)
    indicating_mask = ((jax.random.uniform(ki, (B, L, F)) > 0.7).astype(jnp.float32)
                       * (1.0 - missing_mask))
    X = X_full * missing_mask          # observed values (missing entries zeroed)
    inputs = {
        "X": X,
        "missing_mask": missing_mask,
        "X_ori": X_full,
        "indicating_mask": indicating_mask,
        "norm_val": jnp.float32(1.0),
    }

    params, freq_index = init_params(kp, cfg)
    results = fedformer_forward(params, freq_index, inputs, cfg, training=True)

    jax.block_until_ready(results["imputed_data"])
    jax.block_until_ready(results["loss"])
    assert results["imputed_data"].shape == (B, L, F)
    assert bool(jnp.all(jnp.isfinite(results["imputed_data"])))
    assert bool(jnp.isfinite(results["loss"]))
    print("KERNEL_OK")
</pallas_src>

<mosaic_0001>
module attributes {stable_mosaic.version = 11 : i64} {
  func.func @_embed_q_kernel(%arg0: i32, %arg1: memref<1x10x8xbf16, #tpu.memory_space<vmem>>, %arg2: memref<3x8x32xbf16, #tpu.memory_space<vmem>>, %arg3: memref<8x32xf32, #tpu.memory_space<vmem>>, %arg4: memref<32x32xbf16, #tpu.memory_space<vmem>>, %arg5: memref<1x32xf32, #tpu.memory_space<vmem>>, %arg6: memref<1x8x32xf32, #tpu.memory_space<vmem>>, %arg7: memref<1x8x32xf32, #tpu.memory_space<vmem>>) attributes {dimension_semantics = [#tpu.dimension_semantics<parallel>], iteration_bounds = array<i64: 2>, scalar_prefetch = 0 : i64, scratch_operands = 0 : i64, tpu.core_type = #tpu.core_type<tc>, window_params = [{transform_indices = @transform_0, window_bounds = array<i64: 1, 10, 8>}, {pipeline_mode = #tpu.pipeline_mode<synchronous>, transform_indices = @transform_1, window_bounds = array<i64: 3, 8, 32>}, {pipeline_mode = #tpu.pipeline_mode<synchronous>, transform_indices = @transform_2, window_bounds = array<i64: 8, 32>}, {pipeline_mode = #tpu.pipeline_mode<synchronous>, transform_indices = @transform_3, window_bounds = array<i64: 32, 32>}, {pipeline_mode = #tpu.pipeline_mode<synchronous>, transform_indices = @transform_4, window_bounds = array<i64: 1, 32>}, {transform_indices = @transform_5, window_bounds = array<i64: 1, 8, 32>}, {transform_indices = @transform_6, window_bounds = array<i64: 1, 8, 32>}]} {
    %cst = arith.constant 0.000000e+00 : f32
    %0 = vector.broadcast %cst : f32 to vector<8x32xf32>
    %c0 = arith.constant 0 : index
    %c0_0 = arith.constant 0 : index
    %c0_1 = arith.constant 0 : index
    %1 = vector.load %arg1[%c0, %c0_0, %c0_1] : memref<1x10x8xbf16, #tpu.memory_space<vmem>>, vector<1x8x8xbf16>
    %2 = vector.shape_cast %1 : vector<1x8x8xbf16> to vector<8x8xbf16>
    %c0_2 = arith.constant 0 : index
    %c0_3 = arith.constant 0 : index
    %c0_4 = arith.constant 0 : index
    %3 = vector.load %arg2[%c0_2, %c0_3, %c0_4] : memref<3x8x32xbf16, #tpu.memory_space<vmem>>, vector<1x8x32xbf16>
    %4 = vector.shape_cast %3 : vector<1x8x32xbf16> to vector<8x32xbf16>
    %cst_5 = arith.constant dense<0.000000e+00> : vector<8x32xf32>
    %5 = tpu.matmul %2, %4, %cst_5 {dimension_numbers = #tpu.dot_dimension_numbers<[1], [0], [0], [1], [0, 0, 1, 1], [], []>} : vector<8x8xbf16>, vector<8x32xbf16>, vector<8x32xf32> -> vector<8x32xf32>
    %6 = arith.addf %0, %5 : vector<8x32xf32>
    %c0_6 = arith.constant 0 : index
    %c1 = arith.constant 1 : index
    %c0_7 = arith.constant 0 : index
    %7 = vector.load %arg1[%c0_6, %c1, %c0_7] : memref<1x10x8xbf16, #tpu.memory_space<vmem>>, vector<1x8x8xbf16>
    %8 = vector.shape_cast %7 : vector<1x8x8xbf16> to vector<8x8xbf16>
    %c1_8 = arith.constant 1 : index
    %c0_9 = arith.constant 0 : index
    %c0_10 = arith.constant 0 : index
    %9 = vector.load %arg2[%c1_8, %c0_9, %c0_10] : memref<3x8x32xbf16, #tpu.memory_space<vmem>>, vector<1x8x32xbf16>
    %10 = vector.shape_cast %9 : vector<1x8x32xbf16> to vector<8x32xbf16>
    %cst_11 = arith.constant dense<0.000000e+00> : vector<8x32xf32>
    %11 = tpu.matmul %8, %10, %cst_11 {dimension_numbers = #tpu.dot_dimension_numbers<[1], [0], [0], [1], [0, 0, 1, 1], [], []>} : vector<8x8xbf16>, vector<8x32xbf16>, vector<8x32xf32> -> vector<8x32xf32>
    %12 = arith.addf %6, %11 : vector<8x32xf32>
    %c0_12 = arith.constant 0 : index
    %c2 = arith.constant 2 : index
    %c0_13 = arith.constant 0 : index
    %13 = vector.load %arg1[%c0_12, %c2, %c0_13] : memref<1x10x8xbf16, #tpu.memory_space<vmem>>, vector<1x8x8xbf16>
    %14 = vector.shape_cast %13 : vector<1x8x8xbf16> to vector<8x8xbf16>
    %c2_14 = arith.constant 2 : index
    %c0_15 = arith.constant 0 : index
    %c0_16 = arith.constant 0 : index
    %15 = vector.load %arg2[%c2_14, %c0_15, %c0_16] : memref<3x8x32xbf16, #tpu.memory_space<vmem>>, vector<1x8x32xbf16>
    %16 = vector.shape_cast %15 : vector<1x8x32xbf16> to vector<8x32xbf16>
    %cst_17 = arith.constant dense<0.000000e+00> : vector<8x32xf32>
    %17 = tpu.matmul %14, %16, %cst_17 {dimension_numbers = #tpu.dot_dimension_numbers<[1], [0], [0], [1], [0, 0, 1, 1], [], []>} : vector<8x8xbf16>, vector<8x32xbf16>, vector<8x32xf32> -> vector<8x32xf32>
    %18 = arith.addf %12, %17 : vector<8x32xf32>
    %19 = vector.shape_cast %18 : vector<8x32xf32> to vector<1x8x32xf32>
    %c0_18 = arith.constant 0 : index
    %c0_19 = arith.constant 0 : index
    %20 = vector.load %arg3[%c0_18, %c0_19] : memref<8x32xf32, #tpu.memory_space<vmem>>, vector<8x32xf32>
    %21 = vector.shape_cast %20 : vector<8x32xf32> to vector<1x8x32xf32>
    %22 = arith.addf %19, %21 : vector<1x8x32xf32>
    %c0_20 = arith.constant 0 : index
    %c0_21 = arith.constant 0 : index
    %c0_22 = arith.constant 0 : index
    %23 = vector.load %arg6[%c0_20, %c0_21, %c0_22] : memref<1x8x32xf32, #tpu.memory_space<vmem>>, vector<1x8x32xf32>
    tpu.vector_store %arg6[%c0_20, %c0_21, %c0_22], %22 {strides = array<i32>} : memref<1x8x32xf32, #tpu.memory_space<vmem>>, vector<1x8x32xf32>,
    %24 = vector.shape_cast %22 : vector<1x8x32xf32> to vector<8x32xf32>
    %25 = arith.truncf %24 : vector<8x32xf32> to vector<8x32xbf16>
    %c0_23 = arith.constant 0 : index
    %c0_24 = arith.constant 0 : index
    %26 = vector.load %arg4[%c0_23, %c0_24] : memref<32x32xbf16, #tpu.memory_space<vmem>>, vector<32x32xbf16>
    %cst_25 = arith.constant dense<0.000000e+00> : vector<8x32xf32>
    %27 = tpu.matmul %25, %26, %cst_25 {dimension_numbers = #tpu.dot_dimension_numbers<[1], [0], [0], [1], [0, 0, 1, 1], [], []>} : vector<8x32xbf16>, vector<32x32xbf16>, vector<8x32xf32> -> vector<8x32xf32>
    %c0_26 = arith.constant 0 : index
    %c0_27 = arith.constant 0 : index
    %28 = vector.load %arg5[%c0_26, %c0_27] : memref<1x32xf32, #tpu.memory_space<vmem>>, vector<1x32xf32>
    %29 = vector.broadcast %28 : vector<1x32xf32> to vector<8x32xf32>
    %30 = arith.addf %27, %29 : vector<8x32xf32>
    %31 = vector.shape_cast %30 : vector<8x32xf32> to vector<1x8x32xf32>
    %c0_28 = arith.constant 0 : index
    %c0_29 = arith.constant 0 : index
    %c0_30 = arith.constant 0 : index
    %32 = vector.load %arg7[%c0_28, %c0_29, %c0_30] : memref<1x8x32xf32, #tpu.memory_space<vmem>>, vector<1x8x32xf32>
    tpu.vector_store %arg7[%c0_28, %c0_29, %c0_30], %31 {strides = array<i32>} : memref<1x8x32xf32, #tpu.memory_space<vmem>>, vector<1x8x32xf32>,
    return
  }
  func.func @transform_0(%arg0: i32) -> (i32, i32, i32) {
    %c0_i32 = arith.constant 0 : i32
    %c0_i32_0 = arith.constant 0 : i32
    %c0_i32_1 = arith.constant 0 : i32
    return %arg0, %c0_i32, %c0_i32_0 : i32, i32, i32
  }
  func.func @transform_1(%arg0: i32) -> (i32, i32, i32) {
    %c0_i32 = arith.constant 0 : i32
    %c0_i32_0 = arith.constant 0 : i32
    %c0_i32_1 = arith.constant 0 : i32
    %c0_i32_2 = arith.constant 0 : i32
    return %c0_i32, %c0_i32_0, %c0_i32_1 : i32, i32, i32
  }
  func.func @transform_2(%arg0: i32) -> (i32, i32) {
    %c0_i32 = arith.constant 0 : i32
    %c0_i32_0 = arith.constant 0 : i32
    %c0_i32_1 = arith.constant 0 : i32
    return %c0_i32, %c0_i32_0 : i32, i32
  }
  func.func @transform_3(%arg0: i32) -> (i32, i32) {
    %c0_i32 = arith.constant 0 : i32
    %c0_i32_0 = arith.constant 0 : i32
    %c0_i32_1 = arith.constant 0 : i32
    return %c0_i32, %c0_i32_0 : i32, i32
  }
  func.func @transform_4(%arg0: i32) -> (i32, i32) {
    %c0_i32 = arith.constant 0 : i32
    %c0_i32_0 = arith.constant 0 : i32
    %c0_i32_1 = arith.constant 0 : i32
    return %c0_i32, %c0_i32_0 : i32, i32
  }
  func.func @transform_5(%arg0: i32) -> (i32, i32, i32) {
    %c0_i32 = arith.constant 0 : i32
    %c0_i32_0 = arith.constant 0 : i32
    %c0_i32_1 = arith.constant 0 : i32
    return %arg0, %c0_i32, %c0_i32_0 : i32, i32, i32
  }
  func.func @transform_6(%arg0: i32) -> (i32, i32, i32) {
    %c0_i32 = arith.constant 0 : i32
    %c0_i32_0 = arith.constant 0 : i32
    %c0_i32_1 = arith.constant 0 : i32
    return %arg0, %c0_i32, %c0_i32_0 : i32, i32, i32
  }
}

</mosaic_0001>

<bundles_post_ra>
// kernel: tpu_custom_call.1
= control target key start
LH: loop header
LB: loop body
LE: loop exit
PB: predicated region body
PF: predicated region fallthrough
CT: control target
= control target key end

     0   :  { %12 = vsyncpa [#allocation3], 0  ;;  %s936_s0 = inlined_call_operand.vmem [shape: bf16[2,10,8], index: 0, kind: input, shape index: {}]   ;;  %s937_s1 = inlined_call_operand.hbm [shape: bf16[3,8,32], index: 1, kind: input, shape index: {}]   ;;  %s938_s2 = inlined_call_operand.vmem [shape: f32[8,32], index: 2, kind: input, shape index: {}]   ;;  %s939_s3 = inlined_call_operand.vmem [shape: bf16[32,32], index: 3, kind: input, shape index: {}]   ;;  %s940_s4 = inlined_call_operand.vmem [shape: f32[1,32], index: 4, kind: input, shape index: {}]   ;;  %s941_s5 = inlined_call_operand.hbm [shape: f32[2,8,32], index: 5, kind: output, shape index: {0}]   ;;  %s942_s6 = inlined_call_operand.hbm [shape: f32[2,8,32], index: 6, kind: output, shape index: {1}]  }
   0x1   :  { %13 = vsyncpa [#allocation4], 0 }
   0x2   :  { %15 = vsyncpa [#allocation4 + $0x1], 0 }
   0x3   :  { %16 = vsyncpa [#allocation7], 0 }
   0x4   :  { %18 = vsyncpa [#allocation7 + $0x1], 0  ;;  %s801_s21 = smov 0   ;;  %s803_s22 = smov 0  }
   0x5   :  { %s805_s23 = smov 0   ;;  %s807_s24 = smov 0  }
   0x6 LB: > { %s822_s25 = sadd.s32 4294967295, %s761_s24   ;;  %s544_s26 = sadd.s32 4294967294, %s761_s24   ;;  %s761_s24 = sphi %s807_s24, %s950_s24   ;;  %s757_s23 = sphi %s805_s23, %s949_s23   ;;  %s753_s22 = sphi %s803_s22, %s948_s22   ;;  %s749_s21 = sphi %s801_s21, %s947_s21  }
   0x7   : > { %s826_s27 = sadd.s32 1, %s761_s24   ;;  %s141_s28 = sadd.s32 1, %s757_s23 }
   0x8   : > { %s138_s29 = ssub.s32 %s761_s24, %s826_s27  ;;  %p151_p0 = scmp.ne.s32.totalorder %s757_s23, %s753_s22 }
   0x9   : > { %p139_p1 = scmp.eq.s32.totalorder %s138_s29, 0  ;;  %p152_p2 = scmp.eq.s32.totalorder %s822_s25, 1 }
   0xa   : > { %p157_p3 = scmp.ne.s32.totalorder %s753_s22, %s749_s21  ;;  %p158_p4 = scmp.eq.s32.totalorder %s544_s26, 1 }
   0xb   : > { %s837_s30 = scalar_select %p139_p1, %s757_s23, %s141_s28  }
   0xc   : > { %p839_p5 = por %p152_p2, %p151_p0  ;;  %p843_p6 = por %p158_p4, %p157_p3 }
   0xd   : > { %p545_p7 = scmp.ge.s32.totalorder %s761_s24, 1  ;;  %p191_p8 = scmp.lt.s32.totalorder %s761_s24, 3 }
   0xe   : > { %p594_p9 = scmp.eq.s32.totalorder %s822_s25, 0  ;;  %s202_s11 = sshll.u32 %s937_s1, 4  ;;  %s203_s11 = int_to_ptr.hbm [resolvable:$true] %s202_s11 }
   0xf   : > { %p192_p10 = pnand %p545_p7, %p191_p8  ;;  %s763_s12 = smov [#allocation2]  }
  0x10   : > { %s204_s13 = sshll.u32 %s763_s12, 4  ;;  %s764_s14 = smov 64   ;;  %s205_s13 = int_to_ptr.vmem [resolvable:$true] %s204_s13 }
  0x11   : > { %p583_p11 = pneg %p192_p10  ;;  %s765_s15 = smov 4  }
  0x12   : > { %237 = sbr.rel (%p192_p10) target bundleno = 316 (0x13c), region = 40 }
  0x13   : > { %p584_p12 = pnand %p594_p9, %p583_p11 }
  0x15   : > { %586 = dma.hbm_to_vmem [thread:$0]  (!%p584_p12), %s203_s11, 192, %s205_s13, [#allocation3], %s764_s14, %s764_s14, %s765_s15  }
  0x17   : > { %736 = dma.done.wait (%p594_p9), [#allocation3], 192  }
  0x18   : > { %738 = vsyncadd (%p594_p9), [#allocation3], 4294967104  ;;  %p273_p13 = scmp.lt.s32.totalorder %s822_s25, 1  ;;  %vm300_vm0 = vcmask 1043456   ;;  %v280_v0 = vld [vmem:[#allocation2] sm:$0xf] }
  0x19   : > { %v338_v1 = vld [vmem:[#allocation2 + $0x8] sm:$0xf]  ;;  %v321_v3 = vsel %vm300_vm0, %v280_v0, 0  ;;  %vm296_vm1 = vcmask 64512   ;;  %v283_v10 = vld [vmem:[#allocation2 + $0x4] sm:$0xf] }
  0x1a   : > { %s274_s16 = scalar_select %p273_p13, %s822_s25, 1  ;;  %v347_v4 = vsel %vm300_vm0, %v338_v1, 0  ;;  %330 = vmatpush.bf16.msra.mxu1 %v321_v3  ;;  %v302_v11 = vsel %vm300_vm0, %v283_v10, 0  ;;  %v574_v19 = vld [vmem:[%s939_s3 + $0x8] sm:$0xff]  ;;  %v573_v20 = vld [vmem:[%s939_s3] sm:$0xff]  ;;  %vm365_vm2 = vcmask 261120  }
  0x1b   : > { %356 = vmatpush.bf16.msra.mxu2 %v347_v4  ;;  %311 = vmatpush.bf16.msra.mxu0 %v302_v11  ;;  %s874_s10 = sand.u32 1, %s753_s22   ;;  %v363_v26 = vld [vmem:[%s938_s2] sm:$0xff]  ;;  %s568_s15 = sshll.u32 %s822_s25, 3 }
  0x1c   : > { %s572_s17 = sshll.u32 %s274_s16, 3  ;;  %397 = vmatpush.bf16.msra.mxu3 %v574_v19  ;;  %s943_s11 = sshll.u32 %s874_s10, 3 }
  0x1d   : > { %s277_s20 = scalar_lea.vmem %s936_s0, %s572_s17  ;;  %s265_s14 = scalar_lea.vmem [#allocation5], %s943_s11 }
  0x1e   : > { %v279_v2 = vld [vmem:[%s277_s20] sm:$0xf]  ;;  %v281_v5 = vld [vmem:[%s277_s20 + $0x4] sm:$0x1]  ;;  %s421_s18 = scalar_lea.hbm %s941_s5, %s568_s15  ;;  %s423_s19 = sshll.u32 %s265_s14, 4  ;;  %s424_s19 = int_to_ptr.vmem [resolvable:$true] %s423_s19 }
  0x1f   : > { %v286_v6 = vunpack.c.l.b16 %v279_v2  ;;  %v336_v7 = vld [vmem:[%s277_s20] sm:$0xe]  ;;  %v287_v8 = vunpack.c.l.b16 %v281_v5  ;;  %555 = vmatmul.msk.bf16.vlgmr.msra.gmra.mxu1 %vm296_vm1, %v279_v2  ;;  %s425_s20 = sshll.u32 %s421_s18, 4  ;;  %s406_s26 = scalar_lea.sflag [#allocation4], %s874_s10  ;;  %s426_s20 = int_to_ptr.hbm [resolvable:$true] %s425_s20 }
  0x20   : > { %v340_v9 = vunpack.c.l.b16 %v336_v7  ;;  %398 = vmatpush.bf16.msra.mxu3 %v573_v20  ;;  %s677_s28 = sshra.s32 %s426_s20, 4  ;;  %s683_s25 = scalar_lea.hbm %s941_s5, 16  ;;  %s678_s28 = int_to_ptr.hbm [resolvable:$true] %s677_s28 }
  0x21   : > { %v288_v12 = vpack.c.b16 %v287_v8, %v286_v6  ;;  %s679_s29 = scalar_lea.hbm %s678_s28, 8  ;;  %p684_p3 = scmp.lt.s32.totalorder %s678_s28, %s941_s5 }
  0x22   : > { %v341_v13 = vpack.c.b16 %v287_v8, %v340_v9  ;;  %p680_p0 = scmp.ne.s32.totalorder %s678_s28, %s679_s29  ;;  %p685_p4 = scmp.lt.s32.totalorder %s683_s25, %s679_s29 }
  0x23   : > { %v290_v15 = vshrl.u32 %v288_v12, 16  ;;  %v292_v16 = vshll.u32 %v288_v12, 16 }
  0x24   : > { %v342_v14 = vrot.slane %v341_v13, 1  ;;  %p681_p1 = pnand %p680_p0, %p839_p5  ;;  %p686_p7 = por %p685_p4, %p684_p3 }
  0x25   : > { %v294_v17 = vrot.slane %v292_v16, 1 }
  0x26   : > { %556 = vmatmul.msk.bf16.vlgmr.msra.gmra.mxu2 %vm296_vm1, %v342_v14  ;;  %p682_p2 = pneg %p681_p1 }
  0x27   : > { %v295_v18 = vor.u32 %v294_v17, %v290_v15 }
  0x28   : > { %p687_p8 = pnand %p686_p7, %p682_p2 }
  0x29   : > { %554 = vmatmul.msk.bf16.vlgmr.msra.gmra.mxu0 %vm296_vm1, %v295_v18 }
  0x9c   : > { %v332_v21 = vpop.f32.mrf.mxu1 }
  0xa4   : > { %v334_v24 = vpop.f32.mrf.mxu1 }
  0xa6   : > { %v313_v22 = vpop.f32.mrf.mxu0 }
  0xa7   : > { %v333_v23 = vadd.f32 %v332_v21, %v313_v22 }
  0xa9   : > { %v358_v25 = vpop.f32.mrf.mxu2 }
  0xaa   : > { %v362_v27 = vadd.f32 %v358_v25, %v333_v23 }
  0xac   : > { %v364_v28 = vadd.f32 %v363_v26, %v362_v27 }
  0xae   : > { %v367_v29 = vpack.c.bf16 %v364_v28, %v364_v28  ;;  %366 = vst.msk [vmem:[%s265_s14] sm:$0xff] %vm365_vm2, %v364_v28  ;;  %v315_v30 = vpop.f32.mrf.mxu0 }
  0xb0   : > { %565 = vmatmul.msk.bf16.vlgmr.msra.gmra.mxu3 %vm365_vm2, %v367_v29 }
  0xb1   : > { %v360_v31 = vpop.f32.mrf.mxu2 }
  0xb2   : > { %690 = shalt.err (!%p687_p8)
}
  0xb3   : > { %579 = dma.vmem_to_hbm [thread:$0]  (%p839_p5), %s424_s19, 128, %s426_s20, %s406_s26   ;;  %v632_v32 = vld [vmem:[%s940_s4] ss:$0 sm:$0xff] }
  0xb4   : > { %s435_s17 = scalar_lea.hbm %s942_s6, %s568_s15  ;;  %s946_s11 = sshll.u32 %s874_s10, 3 }
  0xb5   : > { %s272_s28 = scalar_lea.vmem [#allocation6], %s946_s11  ;;  %s439_s12 = sshll.u32 %s435_s17, 4  ;;  %s440_s12 = int_to_ptr.hbm [resolvable:$true] %s439_s12 }
  0xb6   : > { %s437_s29 = sshll.u32 %s272_s28, 4  ;;  %s411_s19 = scalar_lea.sflag [#allocation7], %s874_s10  ;;  %s438_s29 = int_to_ptr.vmem [resolvable:$true] %s437_s29 }
  0xb7   : > { %s705_s20 = sshra.s32 %s440_s12, 4  ;;  %s711_s13 = scalar_lea.hbm %s942_s6, 16  ;;  %s706_s20 = int_to_ptr.hbm [resolvable:$true] %s705_s20 }
  0xb8   : > { %s707_s26 = scalar_lea.hbm %s706_s20, 8  ;;  %p712_p12 = scmp.lt.s32.totalorder %s706_s20, %s942_s6 }
  0xb9   : > { %p708_p9 = scmp.ne.s32.totalorder %s706_s20, %s707_s26  ;;  %p713_p13 = scmp.lt.s32.totalorder %s711_s13, %s707_s26 }
  0xbb   : > { %p709_p10 = pnand %p708_p9, %p839_p5  ;;  %p714_p0 = por %p713_p13, %p712_p12 }
  0xbd   : > { %p710_p11 = pneg %p709_p10 }
  0xbf   : > { %p715_p1 = pnand %p714_p0, %p710_p11 }
 0x133   : > { %v400_v33 = vpop.f32.mrf.mxu3 }
 0x134   : > { %v401_v34 = vadd.f32 %v632_v32, %v400_v33 }
 0x136   : > { %404 = vst.msk [vmem:[%s272_s28] sm:$0xff] %vm365_vm2, %v401_v34 }
 0x137   : > { %718 = shalt.err (!%p715_p1)
}
 0x138   : > { %580 = dma.vmem_to_hbm [thread:$0]  (%p839_p5), %s438_s29, 128, %s440_s12, %s411_s19  }
 0x13b   : > { %v402_v35 = vpop.f32.mrf.mxu3 }
 0x13c PF: > { %p596_p2 = scmp.ge.s32.totalorder %s761_s24, 2  ;;  %s451_s10 = sand.u32 1, %s749_s21  }
 0x13d   : > { %s452_s17 = scalar_lea.sflag [#allocation4], %s451_s10 }
 0x13e   : > { %p588_p3 = pnand %p596_p2, %p843_p6 }
 0x140   : > { %p589_p4 = pneg %p588_p3 }
 0x142   : > { %740 = dma.done.wait (%p589_p4), %s452_s17, 128  }
 0x143   : > { %742 = vsyncadd (%p589_p4), %s452_s17, 4294967168  ;;  %s462_s18 = scalar_lea.sflag [#allocation7], %s451_s10 }
 0x144   : > { %744 = dma.done.wait (%p589_p4), %s462_s18, 128  }
 0x145   : > { %746 = vsyncadd (%p589_p4), %s462_s18, 4294967168  ;;  %p21_p5 = scmp.ge.s32.totalorder %s826_s27, 4   ;;  %s947_s21 = smov %s753_s22 }
 0x146   : > { %s948_s22 = smov %s757_s23  ;;  %s949_s23 = smov %s837_s30 }
 0x147   : > { %s950_s24 = smov %s826_s27  ;;  %23 = sbr.rel (!%p21_p5) target bundleno = 6 (0x6), region = 99 }
 0x14c   :  { %468 = vsyncpa [#allocation3], 1 }
 0x14d   :  { %470 = vsyncpa [#allocation3 + $0x1], 1 }
 0x14e   :  { %471 = vsyncpa [#allocation4], 1 }
 0x14f   :  { %473 = vsyncpa [#allocation4 + $0x1], 1 }
 0x150   :  { %474 = vsyncpa [#allocation7], 1 }
 0x151   :  { %476 = vsyncpa [#allocation7 + $0x1], 1 }

</bundles_post_ra>
